<compile_context>
chip_gen: v6e
topology: v6e:2x2x1
jax: 0.10.0
libtpu: 0.0.40
codegen_flags: <defaults>
</compile_context>

<pallas_src>
import functools

import numpy as np
import jax
import jax.numpy as jnp
from jax.experimental import pallas as pl
from jax.experimental.pallas import tpu as pltpu


# ----------------------------------------------------------------------------
# Precomputed constants (numpy, trace-time only): additive attention mask and
# the g-order -> quirky-order row permutation, both in the kernel's internal
# "g-ordering":   row g = k*(B*T) + b*T + t   holds lane-chunk k of token t of
# batch b, which is quirky (b, h, t2) with  h*T + t2 = t*n_heads + k.
# ----------------------------------------------------------------------------
def _build_constants(B, T, E, n_heads):
    d = E // n_heads
    assert n_heads * d == E
    G = B * T * n_heads                       # rows of the g-ordered slabs

    g = np.arange(G)
    k = g // (B * T)                          # lane-chunk index
    bt = g % (B * T)
    b = bt // T
    t = bt % T
    ht = t * n_heads + k                      # == h*T + t2 (quirky flat index)
    h = ht // T
    t2 = ht % T

    # keep iff same batch, same head, causal within the quirky token axis
    keep = (
        (b[:, None] == b[None, :])
        & (h[:, None] == h[None, :])
        & (t2[:, None] >= t2[None, :])
    )
    mask_add = np.where(keep, 0.0, -np.inf).astype(np.float32)

    # permutation: quirky-ordered row  b*(H*T) + h*T + t2   <-  g-ordered row g
    target = b * (n_heads * T) + h * T + t2
    perm = np.zeros((G, G), np.float32)
    perm[target, g] = 1.0

    return jnp.asarray(mask_add), jnp.asarray(perm)


def prepare_qkv_weight(W_Q, W_K, W_V):
    """Done ONCE at parameter-setup time (hoisted out of the forward)."""
    return jnp.concatenate([W_Q, W_K, W_V], axis=0)  # (3E, E), torch (out,in)


# ----------------------------------------------------------------------------
# Fused kernel: single grid step, fully VMEM-resident.
#   QKV projection -> g-order split -> all-heads/all-batch masked attention
#   -> MXU row permutation -> head merge -> pool matmul.
# ----------------------------------------------------------------------------
def _mha_fused_kernel(x_ref, wqkv_ref, wpool_ref, mask_ref, perm_ref, o_ref,
                      *, n_heads, head_dim, B, T):
    E = x_ref.shape[-1]
    d = head_dim
    HT = n_heads * T

    x = x_ref[...]            # (B*T, E)
    w_qkv = wqkv_ref[...]     # (3E, E)   torch layout (out_features, in_features)
    w_pool = wpool_ref[...]   # (E, E)
    mask_add = mask_ref[...]  # (G, G)    0 where attend, -inf otherwise
    perm = perm_ref[...]      # (G, G)    0/1 permutation matrix

    # qkv = x @ W_qkv.T : contract on the weights' in_features axis (no
    # transposed weight copy is materialized).  One MXU call, B*T rows.
    qkv = jax.lax.dot_general(
        x, w_qkv, dimension_numbers=(((1,), (1,)), ((), ())),
        preferred_element_type=jnp.float32,
    )  # (B*T, 3E)

    def g_slab(base):
        # (B*T, E) column-slab at offset `base`, re-laid-out to (G, d) in
        # g-order: 4 static lane slices + 1 aligned sublane concat
        # (replaces the old 32-slice-per-tensor storm).
        pieces = [qkv[:, base + k * d: base + (k + 1) * d]
                  for k in range(n_heads)]
        return jnp.concatenate(pieces, axis=0)        # (G, d)

    scale = jnp.float32(1.0 / (d ** 0.5))
    q_g = g_slab(0) * scale      # fold 1/sqrt(d) into Q (smallest operand)
    k_g = g_slab(E)
    v_g = g_slab(2 * E)

    # All heads x all batch elements in ONE scores matmul + ONE softmax.
    s = jax.lax.dot_general(
        q_g, k_g, dimension_numbers=(((1,), (1,)), ((), ())),
        preferred_element_type=jnp.float32,
    )                                                  # (G, G)
    s = s + mask_add                                   # causal/head/batch mask

    m = jnp.max(s, axis=-1, keepdims=True)             # rows always keep diag
    p = jnp.exp(s - m)
    attn = p / jnp.sum(p, axis=-1, keepdims=True)      # exact divide (no approx)

    ctx_g = jnp.dot(attn, v_g, preferred_element_type=jnp.float32)   # (G, d)

    # Row permutation g-order -> quirky (b, h, t2) order on the idle MXU.
    ctx_q = jnp.dot(perm, ctx_g, preferred_element_type=jnp.float32)  # (G, d)

    # Head merge: merged[b*T + t2, h*d + j] = ctx_q[b*H*T + h*T + t2, j]
    # 8 vreg-aligned sublane slices + lane concats (== transpose(1,2).view).
    batch_rows = []
    for b in range(B):
        head_pieces = [ctx_q[b * HT + h * T: b * HT + (h + 1) * T, :]
                       for h in range(n_heads)]
        batch_rows.append(jnp.concatenate(head_pieces, axis=-1))  # (T, E)
    merged = jnp.concatenate(batch_rows, axis=0)                  # (B*T, E)

    # pooled = merged @ W_pool.T  — single lane-dense (B*T, E) store.
    out = jax.lax.dot_general(
        merged, w_pool, dimension_numbers=(((1,), (1,)), ((), ())),
        preferred_element_type=jnp.float32,
    )
    o_ref[...] = out.astype(o_ref.dtype)


# ----------------------------------------------------------------------------
# Wrapper: ONE pallas_call, single grid step (grid collapse per review).
# ----------------------------------------------------------------------------
def multi_head_attention(token_embeddings, W_qkv, W_pool, n_heads):
    B, T, E = token_embeddings.shape
    assert E % n_heads == 0
    head_dim = E // n_heads
    G = B * T * n_heads

    mask_add, perm = _build_constants(B, T, E, n_heads)   # trace-time constants

    x_flat = token_embeddings.reshape(B * T, E)           # contiguous, free

    kernel = functools.partial(
        _mha_fused_kernel, n_heads=n_heads, head_dim=head_dim, B=B, T=T
    )

    out_flat = pl.pallas_call(
        kernel,
        out_shape=jax.ShapeDtypeStruct((B * T, E), token_embeddings.dtype),
        grid=(1,),
        in_specs=[
            pl.BlockSpec((B * T, E), lambda i: (0, 0)),    # x (flattened batch)
            pl.BlockSpec((3 * E, E), lambda i: (0, 0)),    # W_qkv (full)
            pl.BlockSpec((E, E), lambda i: (0, 0)),        # W_pool (full)
            pl.BlockSpec((G, G), lambda i: (0, 0)),        # additive mask
            pl.BlockSpec((G, G), lambda i: (0, 0)),        # row permutation
        ],
        out_specs=pl.BlockSpec((B * T, E), lambda i: (0, 0)),
        compiler_params=pltpu.CompilerParams(
            dimension_semantics=("arbitrary",),
        ),
    )(x_flat, W_qkv, W_pool, mask_add, perm)

    return out_flat.reshape(B, T, E)


# ----------------------------------------------------------------------------
# Pure-JAX reference (same math, highest matmul precision) for correctness.
# ----------------------------------------------------------------------------
def reference_mha(x, W_Q, W_K, W_V, W_pool, n_heads):
    B, T, E = x.shape
    d = E // n_heads
    hp = jax.lax.Precision.HIGHEST
    Q = jnp.einsum("bte,oe->bto", x, W_Q, precision=hp).reshape(B, n_heads, T, d)
    K = jnp.einsum("bte,oe->bto", x, W_K, precision=hp).reshape(B, n_heads, T, d)
    V = jnp.einsum("bte,oe->bto", x, W_V, precision=hp).reshape(B, n_heads, T, d)
    s = jnp.einsum("bhtd,bhsd->bhts", Q, K, precision=hp)
    keep = jnp.tril(jnp.ones((T, T), x.dtype))
    add = jnp.triu(jnp.full((T, T), -jnp.inf, x.dtype), k=1)
    s = s * keep + add
    a = jax.nn.softmax(s / (d ** 0.5), axis=-1)
    ctx = jnp.einsum("bhts,bhsd->bhtd", a, V, precision=hp)
    merged = jnp.transpose(ctx, (0, 2, 1, 3)).reshape(B, T, E)
    return jnp.einsum("bte,oe->bto", merged, W_pool, precision=hp)


if __name__ == "__main__":
    # Shapes implied by the forward: batch=2, n_tokens=8, embedding=32,
    # n_heads=4 -> head_dim=8.
    B, T, E, H = 2, 8, 32, 4

    key = jax.random.PRNGKey(0)
    kx, kq, kk, kv, kp = jax.random.split(key, 5)
    x = jax.random.normal(kx, (B, T, E), dtype=jnp.float32)
    # Deterministic synthetic params, torch Linear shape (out_features, in_features).
    W_Q = jax.random.normal(kq, (E, E), dtype=jnp.float32) * 0.1
    W_K = jax.random.normal(kk, (E, E), dtype=jnp.float32) * 0.1
    W_V = jax.random.normal(kv, (E, E), dtype=jnp.float32) * 0.1
    W_pool = jax.random.normal(kp, (E, E), dtype=jnp.float32) * 0.1

    # Parameter-setup-time work (hoisted out of the jitted forward).
    W_qkv = prepare_qkv_weight(W_Q, W_K, W_V)

    fwd = jax.jit(functools.partial(multi_head_attention, n_heads=H))
    out = jax.block_until_ready(fwd(x, W_qkv, W_pool))

    ref = reference_mha(x, W_Q, W_K, W_V, W_pool, H)
    assert out.shape == (B, T, E)
    # Exact softmax divide (no approx reciprocal) -> much tighter tolerance
    # than the previous 1e-2; 1e-3 leaves margin for MXU f32 pass rounding
    # while still catching any structural / masking / head-split error.
    assert jnp.allclose(out, ref, rtol=1e-3, atol=1e-3), "mismatch vs reference"

    print("KERNEL_OK")
</pallas_src>

<mosaic_0001>
module attributes {stable_mosaic.version = 11 : i64} {
  func.func @_mha_fused_kernel(%arg0: i32, %arg1: memref<16x32xf32, #tpu.memory_space<vmem>>, %arg2: memref<96x32xf32, #tpu.memory_space<vmem>>, %arg3: memref<32x32xf32, #tpu.memory_space<vmem>>, %arg4: memref<64x64xf32, #tpu.memory_space<vmem>>, %arg5: memref<64x64xf32, #tpu.memory_space<vmem>>, %arg6: memref<16x32xf32, #tpu.memory_space<vmem>>) attributes {dimension_semantics = [#tpu.dimension_semantics<arbitrary>], iteration_bounds = array<i64: 1>, scalar_prefetch = 0 : i64, scratch_operands = 0 : i64, tpu.core_type = #tpu.core_type<tc>, window_params = [{pipeline_mode = #tpu.pipeline_mode<synchronous>, transform_indices = @transform_0, window_bounds = array<i64: 16, 32>}, {pipeline_mode = #tpu.pipeline_mode<synchronous>, transform_indices = @transform_1, window_bounds = array<i64: 96, 32>}, {pipeline_mode = #tpu.pipeline_mode<synchronous>, transform_indices = @transform_2, window_bounds = array<i64: 32, 32>}, {pipeline_mode = #tpu.pipeline_mode<synchronous>, transform_indices = @transform_3, window_bounds = array<i64: 64, 64>}, {pipeline_mode = #tpu.pipeline_mode<synchronous>, transform_indices = @transform_4, window_bounds = array<i64: 64, 64>}, {pipeline_mode = #tpu.pipeline_mode<synchronous>, transform_indices = @transform_5, window_bounds = array<i64: 16, 32>}]} {
    %c0 = arith.constant 0 : index
    %c0_0 = arith.constant 0 : index
    %0 = vector.load %arg1[%c0, %c0_0] : memref<16x32xf32, #tpu.memory_space<vmem>>, vector<16x32xf32>
    %c0_1 = arith.constant 0 : index
    %c0_2 = arith.constant 0 : index
    %1 = vector.load %arg2[%c0_1, %c0_2] : memref<96x32xf32, #tpu.memory_space<vmem>>, vector<96x32xf32>
    %c0_3 = arith.constant 0 : index
    %c0_4 = arith.constant 0 : index
    %2 = vector.load %arg3[%c0_3, %c0_4] : memref<32x32xf32, #tpu.memory_space<vmem>>, vector<32x32xf32>
    %c0_5 = arith.constant 0 : index
    %c0_6 = arith.constant 0 : index
    %3 = vector.load %arg4[%c0_5, %c0_6] : memref<64x64xf32, #tpu.memory_space<vmem>>, vector<64x64xf32>
    %c0_7 = arith.constant 0 : index
    %c0_8 = arith.constant 0 : index
    %4 = vector.load %arg5[%c0_7, %c0_8] : memref<64x64xf32, #tpu.memory_space<vmem>>, vector<64x64xf32>
    %cst = arith.constant dense<0.000000e+00> : vector<16x96xf32>
    %5 = tpu.matmul %0, %1, %cst {dimension_numbers = #tpu.dot_dimension_numbers<[1], [1], [0], [0], [0, 0, 1, 0], [], []>} : vector<16x32xf32>, vector<96x32xf32>, vector<16x96xf32> -> vector<16x96xf32>
    %6 = vector.extract_strided_slice %5 {offsets = [0, 0], sizes = [16, 8], strides = [1, 1]} : vector<16x96xf32> to vector<16x8xf32>
    %7 = vector.extract_strided_slice %5 {offsets = [0, 8], sizes = [16, 8], strides = [1, 1]} : vector<16x96xf32> to vector<16x8xf32>
    %8 = vector.extract_strided_slice %5 {offsets = [0, 16], sizes = [16, 8], strides = [1, 1]} : vector<16x96xf32> to vector<16x8xf32>
    %9 = vector.extract_strided_slice %5 {offsets = [0, 24], sizes = [16, 8], strides = [1, 1]} : vector<16x96xf32> to vector<16x8xf32>
    %10 = tpu.concatenate %6, %7, %8, %9 in 0 : vector<16x8xf32>, vector<16x8xf32>, vector<16x8xf32>, vector<16x8xf32> -> vector<64x8xf32>
    %cst_9 = arith.constant 0.353553385 : f32
    %11 = vector.broadcast %cst_9 : f32 to vector<64x8xf32>
    %12 = arith.mulf %10, %11 : vector<64x8xf32>
    %13 = vector.extract_strided_slice %5 {offsets = [0, 32], sizes = [16, 8], strides = [1, 1]} : vector<16x96xf32> to vector<16x8xf32>
    %14 = vector.extract_strided_slice %5 {offsets = [0, 40], sizes = [16, 8], strides = [1, 1]} : vector<16x96xf32> to vector<16x8xf32>
    %15 = vector.extract_strided_slice %5 {offsets = [0, 48], sizes = [16, 8], strides = [1, 1]} : vector<16x96xf32> to vector<16x8xf32>
    %16 = vector.extract_strided_slice %5 {offsets = [0, 56], sizes = [16, 8], strides = [1, 1]} : vector<16x96xf32> to vector<16x8xf32>
    %17 = tpu.concatenate %13, %14, %15, %16 in 0 : vector<16x8xf32>, vector<16x8xf32>, vector<16x8xf32>, vector<16x8xf32> -> vector<64x8xf32>
    %18 = vector.extract_strided_slice %5 {offsets = [0, 64], sizes = [16, 8], strides = [1, 1]} : vector<16x96xf32> to vector<16x8xf32>
    %19 = vector.extract_strided_slice %5 {offsets = [0, 72], sizes = [16, 8], strides = [1, 1]} : vector<16x96xf32> to vector<16x8xf32>
    %20 = vector.extract_strided_slice %5 {offsets = [0, 80], sizes = [16, 8], strides = [1, 1]} : vector<16x96xf32> to vector<16x8xf32>
    %21 = vector.extract_strided_slice %5 {offsets = [0, 88], sizes = [16, 8], strides = [1, 1]} : vector<16x96xf32> to vector<16x8xf32>
    %22 = tpu.concatenate %18, %19, %20, %21 in 0 : vector<16x8xf32>, vector<16x8xf32>, vector<16x8xf32>, vector<16x8xf32> -> vector<64x8xf32>
    %cst_10 = arith.constant dense<0.000000e+00> : vector<64x64xf32>
    %23 = tpu.matmul %12, %17, %cst_10 {dimension_numbers = #tpu.dot_dimension_numbers<[1], [1], [0], [0], [0, 0, 1, 0], [], []>} : vector<64x8xf32>, vector<64x8xf32>, vector<64x64xf32> -> vector<64x64xf32>
    %24 = arith.addf %23, %3 : vector<64x64xf32>
    %cst_11 = arith.constant dense<0xFF800000> : vector<64xf32>
    %25 = vector.multi_reduction <maximumf>, %24, %cst_11 [1] : vector<64x64xf32> to vector<64xf32>
    %26 = vector.shape_cast %25 : vector<64xf32> to vector<64x1xf32>
    %27 = vector.broadcast %26 : vector<64x1xf32> to vector<64x64xf32>
    %28 = arith.subf %24, %27 : vector<64x64xf32>
    %29 = math.exp %28 : vector<64x64xf32>
    %cst_12 = arith.constant dense<0.000000e+00> : vector<64xf32>
    %30 = vector.multi_reduction <add>, %29, %cst_12 [1] : vector<64x64xf32> to vector<64xf32>
    %31 = vector.shape_cast %30 : vector<64xf32> to vector<64x1xf32>
    %32 = vector.broadcast %31 : vector<64x1xf32> to vector<64x64xf32>
    %33 = arith.divf %29, %32 : vector<64x64xf32>
    %cst_13 = arith.constant dense<0.000000e+00> : vector<64x8xf32>
    %34 = tpu.matmul %33, %22, %cst_13 {dimension_numbers = #tpu.dot_dimension_numbers<[1], [0], [0], [1], [0, 0, 1, 1], [], []>} : vector<64x64xf32>, vector<64x8xf32>, vector<64x8xf32> -> vector<64x8xf32>
    %cst_14 = arith.constant dense<0.000000e+00> : vector<64x8xf32>
    %35 = tpu.matmul %4, %34, %cst_14 {dimension_numbers = #tpu.dot_dimension_numbers<[1], [0], [0], [1], [0, 0, 1, 1], [], []>} : vector<64x64xf32>, vector<64x8xf32>, vector<64x8xf32> -> vector<64x8xf32>
    %36 = vector.extract_strided_slice %35 {offsets = [0, 0], sizes = [8, 8], strides = [1, 1]} : vector<64x8xf32> to vector<8x8xf32>
    %37 = vector.extract_strided_slice %35 {offsets = [8, 0], sizes = [8, 8], strides = [1, 1]} : vector<64x8xf32> to vector<8x8xf32>
    %38 = vector.extract_strided_slice %35 {offsets = [16, 0], sizes = [8, 8], strides = [1, 1]} : vector<64x8xf32> to vector<8x8xf32>
    %39 = vector.extract_strided_slice %35 {offsets = [24, 0], sizes = [8, 8], strides = [1, 1]} : vector<64x8xf32> to vector<8x8xf32>
    %40 = tpu.concatenate %36, %37, %38, %39 in 1 : vector<8x8xf32>, vector<8x8xf32>, vector<8x8xf32>, vector<8x8xf32> -> vector<8x32xf32>
    %41 = vector.extract_strided_slice %35 {offsets = [32, 0], sizes = [8, 8], strides = [1, 1]} : vector<64x8xf32> to vector<8x8xf32>
    %42 = vector.extract_strided_slice %35 {offsets = [40, 0], sizes = [8, 8], strides = [1, 1]} : vector<64x8xf32> to vector<8x8xf32>
    %43 = vector.extract_strided_slice %35 {offsets = [48, 0], sizes = [8, 8], strides = [1, 1]} : vector<64x8xf32> to vector<8x8xf32>
    %44 = vector.extract_strided_slice %35 {offsets = [56, 0], sizes = [8, 8], strides = [1, 1]} : vector<64x8xf32> to vector<8x8xf32>
    %45 = tpu.concatenate %41, %42, %43, %44 in 1 : vector<8x8xf32>, vector<8x8xf32>, vector<8x8xf32>, vector<8x8xf32> -> vector<8x32xf32>
    %46 = tpu.concatenate %40, %45 in 0 : vector<8x32xf32>, vector<8x32xf32> -> vector<16x32xf32>
    %cst_15 = arith.constant dense<0.000000e+00> : vector<16x32xf32>
    %47 = tpu.matmul %46, %2, %cst_15 {dimension_numbers = #tpu.dot_dimension_numbers<[1], [1], [0], [0], [0, 0, 1, 0], [], []>} : vector<16x32xf32>, vector<32x32xf32>, vector<16x32xf32> -> vector<16x32xf32>
    %c0_16 = arith.constant 0 : index
    %c0_17 = arith.constant 0 : index
    %48 = vector.load %arg6[%c0_16, %c0_17] : memref<16x32xf32, #tpu.memory_space<vmem>>, vector<16x32xf32>
    tpu.vector_store %arg6[%c0_16, %c0_17], %47 {strides = array<i32>} : memref<16x32xf32, #tpu.memory_space<vmem>>, vector<16x32xf32>,
    return
  }
  func.func @transform_0(%arg0: i32) -> (i32, i32) {
    %c0_i32 = arith.constant 0 : i32
    %c0_i32_0 = arith.constant 0 : i32
    %c0_i32_1 = arith.constant 0 : i32
    return %c0_i32, %c0_i32_0 : i32, i32
  }
  func.func @transform_1(%arg0: i32) -> (i32, i32) {
    %c0_i32 = arith.constant 0 : i32
    %c0_i32_0 = arith.constant 0 : i32
    %c0_i32_1 = arith.constant 0 : i32
    return %c0_i32, %c0_i32_0 : i32, i32
  }
  func.func @transform_2(%arg0: i32) -> (i32, i32) {
    %c0_i32 = arith.constant 0 : i32
    %c0_i32_0 = arith.constant 0 : i32
    %c0_i32_1 = arith.constant 0 : i32
    return %c0_i32, %c0_i32_0 : i32, i32
  }
  func.func @transform_3(%arg0: i32) -> (i32, i32) {
    %c0_i32 = arith.constant 0 : i32
    %c0_i32_0 = arith.constant 0 : i32
    %c0_i32_1 = arith.constant 0 : i32
    return %c0_i32, %c0_i32_0 : i32, i32
  }
  func.func @transform_4(%arg0: i32) -> (i32, i32) {
    %c0_i32 = arith.constant 0 : i32
    %c0_i32_0 = arith.constant 0 : i32
    %c0_i32_1 = arith.constant 0 : i32
    return %c0_i32, %c0_i32_0 : i32, i32
  }
  func.func @transform_5(%arg0: i32) -> (i32, i32) {
    %c0_i32 = arith.constant 0 : i32
    %c0_i32_0 = arith.constant 0 : i32
    %c0_i32_1 = arith.constant 0 : i32
    return %c0_i32, %c0_i32_0 : i32, i32
  }
}

</mosaic_0001>

<bundles_post_ra>
// kernel: multi_head_attention.1
= control target key start
LH: loop header
LB: loop body
LE: loop exit
PB: predicated region body
PF: predicated region fallthrough
CT: control target
= control target key end

     0   :  { %10 = vsyncpa [#allocation3], 0  ;;  %s1579_s0 = inlined_call_operand.hbm [shape: f32[16,32], index: 0, kind: input, shape index: {}]   ;;  %s1580_s1 = inlined_call_operand.vmem [shape: f32[96,32], index: 1, kind: input, shape index: {}]   ;;  %s1581_s2 = inlined_call_operand.hbm [shape: f32[32,32], index: 2, kind: input, shape index: {}]   ;;  %s1582_s3 = inlined_call_operand.vmem [shape: f32[64,64], index: 3, kind: input, shape index: {}]   ;;  %s1583_s4 = inlined_call_operand.vmem [shape: f32[64,64], index: 4, kind: input, shape index: {}]   ;;  %s1584_s5 = inlined_call_operand.hbm [shape: f32[16,32], index: 5, kind: output, shape index: {}]  }
   0x1   :  { %11 = vsyncpa [#allocation6], 0 }
   0x2   :  { %12 = vsyncpa [#allocation4], 0  ;;  %s1259_s18 = smov [#allocation2]  }
   0x3   :  { %s18_s19 = sshll.u32 %s1259_s18, 4  ;;  %s19_s19 = int_to_ptr.vmem [resolvable:$true] %s18_s19 }
   0x4   :  { %s1201_s20 = scalar_lea.vmem %s19_s19, 256  ;;  %p1206_p1 = scmp.lt.s32.totalorder %s19_s19, %s19_s19 }
   0x5   :  { %p1202_p0 = scmp.ne.s32.totalorder %s19_s19, %s1201_s20  ;;  %p1207_p2 = scmp.lt.s32.totalorder %s1201_s20, %s1201_s20 }
   0x7   :  { %p1208_p3 = por %p1207_p2, %p1206_p1 }
   0x9   :  { %p1209_p4 = pnand %p1208_p3, %p1202_p0 }
   0xb   :  { %1212 = shalt.err (!%p1209_p4)
}
   0xc   :  { %s1260_s21 = smov 128   ;;  %s1261_s22 = smov 8  }
   0xd   :  { %24 = dma.hbm_to_vmem [thread:$0]  %s1579_s0, 256, %s19_s19, [#allocation3], %s1260_s21, %s1260_s21, %s1261_s22  }
   0xe   :  { %s1262_s25 = smov [#allocation5]  }
   0xf   :  { %s32_s26 = sshll.u32 %s1262_s25, 4  ;;  %s33_s26 = int_to_ptr.vmem [resolvable:$true] %s32_s26 }
  0x10   :  { %s1221_s27 = scalar_lea.vmem %s33_s26, 512  ;;  %p1226_p6 = scmp.lt.s32.totalorder %s33_s26, %s33_s26 }
  0x11   :  { %p1222_p5 = scmp.ne.s32.totalorder %s33_s26, %s1221_s27  ;;  %p1227_p7 = scmp.lt.s32.totalorder %s1221_s27, %s1221_s27 }
  0x13   :  { %p1228_p8 = por %p1227_p7, %p1226_p6 }
  0x15   :  { %p1229_p9 = pnand %p1228_p8, %p1222_p5 }
  0x17   :  { %1232 = shalt.err (!%p1229_p9)
}
  0x18   :  { %38 = dma.hbm_to_vmem [thread:$0]  %s1581_s2, 512, %s33_s26, [#allocation6], %s1260_s21, %s1260_s21, %s1261_s22  }
  0x19   :  { %1253 = dma.done.wait [#allocation3], 256  }
  0x1a   :  { %1254 = vsyncadd [#allocation3], 4294967040 }
  0x1b   :  { %1255 = dma.done.wait [#allocation6], 512  }
  0x1c   :  { %1256 = vsyncadd [#allocation6], 4294966784  ;;  %vm83_vm0 = vcmask 261120   ;;  %v62_v0 = vld [vmem:[%s1580_s1 + $0x58] sm:$0xff]  ;;  %v61_v1 = vld [vmem:[%s1580_s1 + $0x50] sm:$0xff]  ;;  %s1263_s29 = smov 112  }
  0x1d   :  { %1027 = vmatprep.subr.msk.mxu0 %vm83_vm0, %v62_v0  ;;  %v60_v2 = vld [vmem:[%s1580_s1 + $0x48] sm:$0xff]  ;;  %v49_v3 = vld [vmem:[#allocation2] sm:$0xff]  ;;  %v58_v5 = vld [vmem:[%s1580_s1 + $0x38] sm:$0xff]  ;;  %s1264_s0 = smov 104   ;;  %vm245_vm1 = vcmask 64512   ;;  %s1266_s30 = smov 96  }
  0x1e   :  { %1028 = vmatpush3.xpose.msk.msra.mxu0 %vm83_vm0, %v62_v0  ;;  %1051 = vmatprep.mubr.msk.f32.mxu0 %vm83_vm0, %v49_v3  ;;  %v59_v4 = vld [vmem:[%s1580_s1 + $0x40] sm:$0xff]  ;;  %v57_v6 = vld [vmem:[%s1580_s1 + $0x30] sm:$0xff]  ;;  %v56_v7 = vld [vmem:[%s1580_s1 + $0x28] sm:$0xff]  ;;  %vm391_vm2 = vcmask 523264   ;;  %s1267_s19 = smov 64   ;;  %s1269_s11 = smov 16  }
  0x1f   :  { %1029 = vmatprep.subr.msk.mxu0 %vm83_vm0, %v61_v1  ;;  %v55_v8 = vld [vmem:[%s1580_s1 + $0x20] sm:$0xff]  ;;  %v54_v9 = vld [vmem:[%s1580_s1 + $0x18] sm:$0xff]  ;;  %v53_v10 = vld [vmem:[%s1580_s1 + $0x10] sm:$0xff]  ;;  %vm775_vm3 = vcmask 130048   ;;  %vm777_vm4 = vcmask 195584   ;;  %s1270_s12 = smov [#allocation7]  }
  0x20   :  { %v52_v11 = vld [vmem:[%s1580_s1 + $0x8] sm:$0xff]  ;;  %v51_v12 = vld [vmem:[%s1580_s1] sm:$0xff]  ;;  %s1265_s1 = smov 120   ;;  %v69_v46 = vld [vmem:[%s1582_s3 + $0x10] sm:$0xff]  ;;  %s894_s13 = sshll.u32 %s1270_s12, 4  ;;  %s895_s13 = int_to_ptr.vmem [resolvable:$true] %s894_s13 }
  0x21   :  { %v50_v13 = vld [vmem:[#allocation2 + $0x8] sm:$0xff]  ;;  %v67_v40 = vld [vmem:[%s1582_s3] sm:$0xff]  ;;  %v70_v48 = vld [vmem:[%s1582_s3 + $0x18] sm:$0xff]  ;;  %s1233_s14 = scalar_lea.vmem %s895_s13, 256  ;;  %p1238_p11 = scmp.lt.s32.totalorder %s895_s13, %s895_s13 }
  0x22   :  { %1030 = vmatpush3.xpose.msk.msra.mxu0 %vm83_vm0, %v61_v1  ;;  %v68_v38 = vld [vmem:[%s1582_s3 + $0x8] sm:$0xff]  ;;  %v71_v52 = vld [vmem:[%s1582_s3 + $0x20] sm:$0xff]  ;;  %v74_v61 = vld [vmem:[%s1582_s3 + $0x38] sm:$0xff]  ;;  %p1234_p10 = scmp.ne.s32.totalorder %s895_s13, %s1233_s14  ;;  %p1239_p12 = scmp.lt.s32.totalorder %s1233_s14, %s1233_s14 }
  0x23   :  { %1031 = vmatprep.subr.msk.mxu0 %vm83_vm0, %v60_v2  ;;  %v72_v55 = vld [vmem:[%s1582_s3 + $0x28] sm:$0xff]  ;;  %v73_v3 = vld [vmem:[%s1582_s3 + $0x30] sm:$0xff] }
  0x24   :  { %p1240_p13 = por %p1239_p12, %p1238_p11 }
  0x26   :  { %1032 = vmatpush3.xpose.msk.msra.mxu0 %vm83_vm0, %v60_v2  ;;  %p1241_p0 = pnand %p1240_p13, %p1234_p10 }
  0x27   :  { %1033 = vmatprep.subr.msk.mxu0 %vm83_vm0, %v59_v4 }
  0x2a   :  { %1034 = vmatpush3.xpose.msk.msra.mxu0 %vm83_vm0, %v59_v4 }
  0x2b   :  { %1035 = vmatprep.subr.msk.mxu0 %vm83_vm0, %v58_v5 }
  0x2e   :  { %1036 = vmatpush3.xpose.msk.msra.mxu0 %vm83_vm0, %v58_v5 }
  0x2f   :  { %1037 = vmatprep.subr.msk.mxu0 %vm83_vm0, %v57_v6 }
  0x32   :  { %1038 = vmatpush3.xpose.msk.msra.mxu0 %vm83_vm0, %v57_v6 }
  0x33   :  { %1039 = vmatprep.subr.msk.mxu0 %vm83_vm0, %v56_v7 }
  0x36   :  { %1040 = vmatpush3.xpose.msk.msra.mxu0 %vm83_vm0, %v56_v7 }
  0x37   :  { %1041 = vmatprep.subr.msk.mxu0 %vm83_vm0, %v55_v8 }
  0x3a   :  { %1042 = vmatpush3.xpose.msk.msra.mxu0 %vm83_vm0, %v55_v8 }
  0x3b   :  { %1043 = vmatprep.subr.msk.mxu0 %vm83_vm0, %v54_v9 }
  0x3e   :  { %1044 = vmatpush3.xpose.msk.msra.mxu0 %vm83_vm0, %v54_v9 }
  0x3f   :  { %1045 = vmatprep.subr.msk.mxu0 %vm83_vm0, %v53_v10 }
  0x42   :  { %1046 = vmatpush3.xpose.msk.msra.mxu0 %vm83_vm0, %v53_v10 }
  0x43   :  { %1047 = vmatprep.subr.msk.mxu0 %vm83_vm0, %v52_v11 }
  0x46   :  { %1048 = vmatpush3.xpose.msk.msra.mxu0 %vm83_vm0, %v52_v11 }
  0x47   :  { %1049 = vmatprep.subr.msk.mxu0 %vm83_vm0, %v51_v12 }
  0x4a   :  { %1050 = vmatpush3.xpose.msk.msra.mxu0 %vm83_vm0, %v51_v12 }
  0x4d   :  { %1052 = vmatmul.mubr.msk.f32.vlgmr.msra.gmra.mxu0 %vm83_vm0, %v50_v13 }
 0x10d   :  { %v1375_v14 = vpop.f32.mrf.mxu0 }
 0x10e   :  { %211 = vrot.lane.b32.xlu1 %v1375_v14, %s1263_s29  ;;  %217 = vrot.lane.b32.xlu0 %v1375_v14, %s1264_s0  ;;  %v222_v31 = vmul.f32 0.35355338, %v1375_v14 }
 0x10f   :  { %v1379_v15 = vpop.f32.mrf.mxu0 }
 0x110   :  { %v221_v16 = vmul.f32 0.35355338, %v1379_v15 }
 0x112   :  { %209 = vrot.lane.b32.xlu1 %v1379_v15, %s1263_s29  ;;  %215 = vrot.lane.b32.xlu0 %v1379_v15, %s1264_s0 }
 0x113   :  { %1070 = vmatprep.mubr.msk.f32.mxu1 %vm245_vm1, %v221_v16 }
 0x116   :  { %203 = vrot.lane.b32.xlu1 %v1379_v15, %s1265_s1  ;;  %205 = vrot.lane.b32.xlu0 %v1375_v14, %s1265_s1 }
 0x180   :  { %v1387_v17 = vpop.permute.xlu1 %211  ;;  %v1389_v18 = vpop.permute.xlu0 %217 }
 0x181   :  { %243 = vrot.lane.b32.xlu0 %v1389_v18, %s1266_s30  ;;  %v226_v35 = vmul.f32 0.35355338, %v1387_v17  ;;  %v228_v37 = vmul.f32 0.35355338, %v1389_v18 }
 0x184   :  { %v1392_v19 = vpop.permute.xlu0 %215  ;;  %v1396_v20 = vpop.permute.xlu1 %209 }
 0x185   :  { %239 = vrot.lane.b32.xlu0 %v1387_v17, %s1266_s30  ;;  %241 = vrot.lane.b32.xlu1 %v1392_v19, %s1266_s30  ;;  %v225_v34 = vmul.f32 0.35355338, %v1396_v20  ;;  %v227_v36 = vmul.f32 0.35355338, %v1392_v19 }
 0x188   :  { %v1398_v21 = vpop.permute.xlu0 %205  ;;  %v1402_v22 = vpop.permute.xlu1 %203 }
 0x189   :  { %237 = vrot.lane.b32.xlu1 %v1396_v20, %s1266_s30  ;;  %235 = vrot.lane.b32.xlu0 %v1398_v21, %s1266_s30  ;;  %v223_v32 = vmul.f32 0.35355338, %v1402_v22  ;;  %v224_v33 = vmul.f32 0.35355338, %v1398_v21 }
 0x18d   :  { %233 = vrot.lane.b32.xlu1 %v1402_v22, %s1266_s30  ;;  %231 = vrot.lane.b32.xlu0 %v1375_v14, %s1266_s30 }
 0x191   :  { %229 = vrot.lane.b32.xlu1 %v1379_v15, %s1266_s30 }
 0x1f3   :  { %v244_v23 = vpop.permute.xlu0 %243 }
 0x1f4   :  { %1054 = vmatprep.subr.msk.mxu1 %vm245_vm1, %v244_v23 }
 0x1f5   :  { %1055 = vmatpush3.xpose.msk.msra.mxu1 %vm245_vm1, %v244_v23 }
 0x1f7   :  { %v242_v24 = vpop.permute.xlu1 %241  ;;  %v240_v25 = vpop.permute.xlu0 %239 }
 0x1f8   :  { %1056 = vmatprep.subr.msk.mxu1 %vm245_vm1, %v242_v24 }
 0x1f9   :  { %1057 = vmatpush3.xpose.msk.msra.mxu1 %vm245_vm1, %v242_v24 }
 0x1fa   :  { %1058 = vmatprep.subr.msk.mxu1 %vm245_vm1, %v240_v25 }
 0x1fb   :  { %v238_v26 = vpop.permute.xlu1 %237  ;;  %v236_v27 = vpop.permute.xlu0 %235 }
 0x1fd   :  { %1059 = vmatpush3.xpose.msk.msra.mxu1 %vm245_vm1, %v240_v25 }
 0x1fe   :  { %1060 = vmatprep.subr.msk.mxu1 %vm245_vm1, %v238_v26 }
 0x1ff   :  { %v234_v28 = vpop.permute.xlu1 %233  ;;  %v232_v29 = vpop.permute.xlu0 %231 }
 0x201   :  { %1061 = vmatpush3.xpose.msk.msra.mxu1 %vm245_vm1, %v238_v26 }
 0x202   :  { %1062 = vmatprep.subr.msk.mxu1 %vm245_vm1, %v236_v27 }
 0x203   :  { %v230_v30 = vpop.permute.xlu1 %229 }
 0x205   :  { %1063 = vmatpush3.xpose.msk.msra.mxu1 %vm245_vm1, %v236_v27 }
 0x206   :  { %1064 = vmatprep.subr.msk.mxu1 %vm245_vm1, %v234_v28 }
 0x209   :  { %1065 = vmatpush3.xpose.msk.msra.mxu1 %vm245_vm1, %v234_v28 }
 0x20a   :  { %1066 = vmatprep.subr.msk.mxu1 %vm245_vm1, %v232_v29 }
 0x20d   :  { %1067 = vmatpush3.xpose.msk.msra.mxu1 %vm245_vm1, %v232_v29 }
 0x20e   :  { %1068 = vmatprep.subr.msk.mxu1 %vm245_vm1, %v230_v30 }
 0x211   :  { %1069 = vmatpush3.xpose.msk.msra.mxu1 %vm245_vm1, %v230_v30 }
 0x214   :  { %1071 = vmatmul.mubr.msk.f32.vlgmr.msra.gmra.mxu1 %vm245_vm1, %v222_v31 }
 0x215   :  { %1073 = vmatprep.mubr.msk.f32.mxu1 %vm245_vm1, %v223_v32 }
 0x218   :  { %1074 = vmatmul.mubr.msk.f32.gmra.mxu1 %vm245_vm1, %v224_v33 }
 0x219   :  { %1076 = vmatprep.mubr.msk.f32.mxu1 %vm245_vm1, %v225_v34 }
 0x21c   :  { %1077 = vmatmul.mubr.msk.f32.gmra.mxu1 %vm245_vm1, %v226_v35 }
 0x21d   :  { %1079 = vmatprep.mubr.msk.f32.mxu1 %vm245_vm1, %v227_v36 }
 0x220   :  { %1080 = vmatmul.mubr.msk.f32.gmra.mxu1 %vm245_vm1, %v228_v37 }
 0x2d4   :  { %v1072_v39 = vpop.f32.mrf.mxu1 }
 0x2d5   :  { %v358_v41 = vadd.f32 %v1072_v39, %v68_v38 }
 0x2d6   :  { %v352_v42 = vpop.f32.mrf.mxu1 }
 0x2d7   :  { %v353_v43 = vadd.f32 %v352_v42, %v67_v40  ;;  %v395_v44 = vsel %vm391_vm2, %v358_v41, -inf }
 0x2d8   :  { %396 = vmax.xlane.f32.xlu1 %v395_v44  ;;  %v1075_v45 = vpop.f32.mrf.mxu1 }
 0x2d9   :  { %v392_v47 = vsel %vm391_vm2, %v353_v43, -inf  ;;  %v368_v53 = vadd.f32 %v1075_v45, %v70_v48 }
 0x2da   :  { %v362_v49 = vpop.f32.mrf.mxu1  ;;  %393 = vmax.xlane.f32.xlu0 %v392_v47 }
 0x2db   :  { %v363_v50 = vadd.f32 %v362_v49, %v69_v46  ;;  %v401_v60 = vsel %vm391_vm2, %v368_v53, -inf }
 0x2dc   :  { %v1078_v51 = vpop.f32.mrf.mxu1 }
 0x2dd   :  { %v398_v54 = vsel %vm391_vm2, %v363_v50, -inf  ;;  %v378_v58 = vadd.f32 %v1078_v51, %v72_v55 }
 0x2de   :  { %v372_v56 = vpop.f32.mrf.mxu1  ;;  %399 = vmax.xlane.f32.xlu0 %v398_v54 }
 0x2df   :  { %v373_v57 = vadd.f32 %v372_v56, %v71_v52  ;;  %v407_v0 = vsel %vm391_vm2, %v378_v58, -inf }
 0x2e0   :  { %v1081_v62 = vpop.f32.mrf.mxu1 }
 0x2e1   :  { %v404_v59 = vsel %vm391_vm2, %v373_v57, -inf  ;;  %v388_v63 = vadd.f32 %v1081_v62, %v74_v61 }
 0x2e2   :  { %405 = vmax.xlane.f32.xlu1 %v404_v59  ;;  %402 = vmax.xlane.f32.xlu0 %v401_v60  ;;  %v382_v2 = vpop.f32.mrf.mxu1 }
 0x2e3   :  { %v413_v1 = vsel %vm391_vm2, %v388_v63, -inf  ;;  %v1476_v4 = vadd.f32 %v382_v2, %v73_v3 }
 0x2e5   :  { %v410_v5 = vsel %vm391_vm2, %v1476_v4, -inf }
 0x2e6   :  { %408 = vmax.xlane.f32.xlu0 %v407_v0 }
 0x2ea   :  { %414 = vmax.xlane.f32.xlu0 %v413_v1 }
 0x2f3   :  { %494 = vrot.lane.b32.xlu1 %v1389_v18, %s1267_s19 }
 0x2f7   :  { %490 = vrot.lane.b32.xlu1 %v1387_v17, %s1267_s19 }
 0x300   :  { %492 = vrot.lane.b32.xlu0 %v1392_v19, %s1267_s19 }
 0x304   :  { %486 = vrot.lane.b32.xlu0 %v1398_v21, %s1267_s19 }
 0x31b   :  { %411 = vmax.xlane.f32.xlu1 %v410_v5 }
 0x32c   :  { %488 = vrot.lane.b32.xlu1 %v1396_v20, %s1267_s19 }
 0x330   :  { %484 = vrot.lane.b32.xlu1 %v1402_v22, %s1267_s19 }
 0x361   :  { %v397_v6 = vpop.xlane.xlu1 %396 }
 0x362   :  { %v417_v7 = vsub.f32 %v358_v41, %v397_v6 }
 0x363   :  { %v394_v8 = vpop.xlane.xlu0 %393 }
 0x364   :  { %v426_v9 = vmul.f32 1.442695, %v417_v7  ;;  %v416_v10 = vsub.f32 %v353_v43, %v394_v8 }
 0x366   :  { %1161 = vpow2.f32 %v426_v9  ;;  %v424_v11 = vmul.f32 1.442695, %v416_v10 }
 0x367   :  { %v400_v12 = vpop.xlane.xlu0 %399 }
 0x368   :  { %1163 = vpow2.f32 %v424_v11  ;;  %v418_v13 = vsub.f32 %v363_v50, %v400_v12 }
 0x36a   :  { %v428_v16 = vmul.f32 1.442695, %v418_v13 }
 0x36b   :  { %v406_v17 = vpop.xlane.xlu1 %405  ;;  %v403_v18 = vpop.xlane.xlu0 %402 }
 0x36c   :  { %1165 = vpow2.f32 %v428_v16  ;;  %v420_v19 = vsub.f32 %v373_v57, %v406_v17  ;;  %v419_v21 = vsub.f32 %v368_v53, %v403_v18  ;;  %v75_v16 = vld [vmem:[%s1583_s4] sm:$0xff] }
 0x36d   :  { %1126 = vmatprep.mubr.msk.f32.mxu0 %vm391_vm2, %v75_v16 }
 0x36e   :  { %v432_v20 = vmul.f32 1.442695, %v420_v19  ;;  %v430_v23 = vmul.f32 1.442695, %v419_v21 }
 0x36f   :  { %v495_v24 = vpop.permute.xlu1 %494  ;;  %v409_v22 = vpop.xlane.xlu0 %408 }
 0x370   :  { %1167 = vpow2.f32 %v432_v20  ;;  %v421_v25 = vsub.f32 %v378_v58, %v409_v22  ;;  %1082 = vmatprep.subr.mxu1 %v495_v24 }
 0x371   :  { %1169 = vpow2.f32 %v430_v23  ;;  %1083 = vmatpush3.msra.mxu1 %v495_v24 }
 0x372   :  { %v434_v26 = vmul.f32 1.442695, %v421_v25  ;;  %v76_v25 = vld [vmem:[%s1583_s4 + $0x8] sm:$0xff] }
 0x373   :  { %v1484_v27 = vpop.eup %1161  ;;  %v415_v28 = vpop.xlane.xlu0 %414 }
 0x374   :  { %1171 = vpow2.f32 %v434_v26  ;;  %v423_v29 = vsub.f32 %v388_v63, %v415_v28  ;;  %v443_v30 = vsel %vm391_vm2, %v1484_v27, 0.0  ;;  %v491_v36 = vpop.permute.xlu1 %490  ;;  %v77_v26 = vld [vmem:[%s1583_s4 + $0x10] sm:$0xff]  ;;  %v79_v28 = vld [vmem:[%s1583_s4 + $0x20] sm:$0xff] }
 0x375   :  { %v1164_v31 = vpop.eup %1163  ;;  %444 = vadd.xlane.f32.xlu0 %v443_v30  ;;  %v81_v30 = vld [vmem:[%s1583_s4 + $0x30] sm:$0xff] }
 0x376   :  { %v438_v32 = vmul.f32 1.442695, %v423_v29  ;;  %v440_v33 = vsel %vm391_vm2, %v1164_v31, 0.0  ;;  %v80_v29 = vld [vmem:[%s1583_s4 + $0x28] sm:$0xff] }
 0x377   :  { %441 = vadd.xlane.f32.xlu1 %v440_v33  ;;  %v493_v34 = vpop.permute.xlu0 %492  ;;  %v65_v33 = vld [vmem:[#allocation5 + $0x10] sm:$0xff] }
 0x378   :  { %1173 = vpow2.f32 %v438_v32  ;;  %1084 = vmatprep.subr.mxu1 %v493_v34  ;;  %v66_v32 = vld [vmem:[#allocation5 + $0x18] sm:$0xff] }
 0x379   :  { %v1489_v35 = vpop.eup %1165  ;;  %1085 = vmatpush3.msra.mxu1 %v493_v34  ;;  %v64_v34 = vld [vmem:[#allocation5 + $0x8] sm:$0xff] }
 0x37a   :  { %1086 = vmatprep.subr.mxu1 %v491_v36  ;;  %v446_v37 = vsel %vm391_vm2, %v1489_v35, 0.0 }
 0x37b   :  { %447 = vadd.xlane.f32.xlu1 %v446_v37  ;;  %1087 = vmatpush3.msra.mxu1 %v491_v36  ;;  %v487_v50 = vpop.permute.xlu0 %486 }
 0x37d   :  { %v1493_v38 = vpop.eup %1167 }
 0x37e   :  { %v1170_v39 = vpop.eup %1169  ;;  %v452_v40 = vsel %vm391_vm2, %v1493_v38, 0.0 }
 0x37f   :  { %453 = vadd.xlane.f32.xlu1 %v452_v40  ;;  %v449_v41 = vsel %vm391_vm2, %v1170_v39, 0.0 }
 0x380   :  { %450 = vadd.xlane.f32.xlu0 %v449_v41 }
 0x381   :  { %v1498_v42 = vpop.eup %1171 }
 0x382   :  { %v455_v43 = vsel %vm391_vm2, %v1498_v42, 0.0 }
 0x384   :  { %456 = vadd.xlane.f32.xlu0 %v455_v43 }
 0x385   :  { %v1502_v44 = vpop.eup %1173 }
 0x386   :  { %v461_v45 = vsel %vm391_vm2, %v1502_v44, 0.0 }
 0x388   :  { %462 = vadd.xlane.f32.xlu0 %v461_v45 }
 0x39e   :  { %482 = vrot.lane.b32.xlu0 %v1375_v14, %s1267_s19 }
 0x3a4   :  { %v412_v46 = vpop.xlane.xlu1 %411 }
 0x3a5   :  { %v422_v47 = vsub.f32 %v1476_v4, %v412_v46 }
 0x3a7   :  { %v436_v48 = vmul.f32 1.442695, %v422_v47 }
 0x3a8   :  { %v489_v49 = vpop.permute.xlu1 %488 }
 0x3a9   :  { %1175 = vpow2.f32 %v436_v48  ;;  %1088 = vmatprep.subr.mxu1 %v489_v49 }
 0x3aa   :  { %1089 = vmatpush3.msra.mxu1 %v489_v49 }
 0x3ab   :  { %1090 = vmatprep.subr.mxu1 %v487_v50 }
 0x3ac   :  { %v485_v51 = vpop.permute.xlu1 %484  ;;  %1091 = vmatpush3.msra.mxu1 %v487_v50 }
 0x3ad   :  { %1092 = vmatprep.subr.mxu1 %v485_v51 }
 0x3ae   :  { %1093 = vmatpush3.msra.mxu1 %v485_v51 }
 0x3b6   :  { %v1176_v52 = vpop.eup %1175 }
 0x3b7   :  { %v458_v53 = vsel %vm391_vm2, %v1176_v52, 0.0 }
 0x3b8   :  { %459 = vadd.xlane.f32.xlu1 %v458_v53 }
 0x3c9   :  { %480 = vrot.lane.b32.xlu1 %v1379_v15, %s1267_s19 }
 0x3fe   :  { %v445_v54 = vpop.xlane.xlu0 %444 }
 0x400   :  { %v442_v14 = vpop.xlane.xlu1 %441 }
 0x401   :  { %1177 = vrcp.f32 %v442_v14 }
 0x402   :  { %1179 = vrcp.f32 %v445_v54 }
 0x404   :  { %v448_v61 = vpop.xlane.xlu1 %447 }
 0x405   :  { %1181 = vrcp.f32 %v448_v61 }
 0x408   :  { %v454_v62 = vpop.xlane.xlu1 %453 }
 0x409   :  { %v451_v55 = vpop.xlane.xlu0 %450 }
 0x40a   :  { %1183 = vrcp.f32 %v451_v55 }
 0x40b   :  { %1185 = vrcp.f32 %v454_v62 }
 0x40d   :  { %v457_v56 = vpop.xlane.xlu0 %456 }
 0x40e   :  { %v1178_v57 = vpop.eup %1177  ;;  %1187 = vrcp.f32 %v457_v56 }
 0x40f   :  { %v465_v58 = vmul.f32 %v1178_v57, %v1164_v31  ;;  %v1180_v63 = vpop.eup %1179  ;;  %v82_v31 = vld [vmem:[%s1583_s4 + $0x38] sm:$0xff] }
 0x410   :  { %v467_v2 = vmul.f32 %v1180_v63, %v1484_v27  ;;  %v78_v27 = vld [vmem:[%s1583_s4 + $0x18] sm:$0xff]  ;;  %s1268_s4 = smov 24  }
 0x411   :  { %v463_v59 = vpop.xlane.xlu0 %462  ;;  %1098 = vmatprep.mubr.msk.f32.mxu1 %vm391_vm2, %v465_v58 }
 0x412   :  { %1189 = vrcp.f32 %v463_v59  ;;  %v1182_v0 = vpop.eup %1181 }
 0x413   :  { %v469_v4 = vmul.f32 %v1182_v0, %v1489_v35  ;;  %v63_v35 = vld [vmem:[#allocation5] sm:$0xff] }
 0x415   :  { %v483_v60 = vpop.permute.xlu0 %482 }
 0x416   :  { %1094 = vmatprep.subr.mxu1 %v483_v60 }
 0x417   :  { %1095 = vmatpush3.msra.mxu1 %v483_v60  ;;  %v1184_v3 = vpop.eup %1183 }
 0x418   :  { %v1186_v5 = vpop.eup %1185  ;;  %v471_v6 = vmul.f32 %v1184_v3, %v1170_v39 }
 0x419   :  { %v473_v8 = vmul.f32 %v1186_v5, %v1493_v38 }
 0x41b   :  { %v1188_v7 = vpop.eup %1187 }
 0x41c   :  { %v475_v10 = vmul.f32 %v1188_v7, %v1498_v42 }
 0x41f   :  { %v1190_v9 = vpop.eup %1189 }
 0x420   :  { %v479_v13 = vmul.f32 %v1190_v9, %v1502_v44 }
 0x441   :  { %v460_v15 = vpop.xlane.xlu1 %459 }
 0x442   :  { %1191 = vrcp.f32 %v460_v15 }
 0x445   :  { %v481_v1 = vpop.permute.xlu1 %480 }
 0x446   :  { %1096 = vmatprep.subr.mxu1 %v481_v1 }
 0x447   :  { %1097 = vmatpush3.msra.mxu1 %v481_v1 }
 0x448   :  { %1099 = vmatmul.mubr.msk.f32.vlgmr.msra.gmra.mxu1 %vm391_vm2, %v467_v2  ;;  %1138 = vmatprep.subr.msk.mxu1 %vm83_vm0, %v66_v32 }
 0x449   :  { %1101 = vmatprep.mubr.msk.f32.mxu1 %vm391_vm2, %v469_v4  ;;  %1139 = vmatpush3.xpose.msk.msra.mxu1 %vm83_vm0, %v66_v32 }
 0x44a   :  { %1140 = vmatprep.subr.msk.mxu1 %vm83_vm0, %v65_v33 }
 0x44c   :  { %1102 = vmatmul.mubr.msk.f32.gmra.mxu1 %vm391_vm2, %v471_v6 }
 0x44d   :  { %1104 = vmatprep.mubr.msk.f32.mxu1 %vm391_vm2, %v473_v8  ;;  %1141 = vmatpush3.xpose.msk.msra.mxu1 %vm83_vm0, %v65_v33 }
 0x44e   :  { %1142 = vmatprep.subr.msk.mxu1 %vm83_vm0, %v64_v34 }
 0x44f   :  { %v1192_v11 = vpop.eup %1191 }
 0x450   :  { %1105 = vmatmul.mubr.msk.f32.gmra.mxu1 %vm391_vm2, %v475_v10  ;;  %v477_v12 = vmul.f32 %v1192_v11, %v1176_v52 }
 0x451   :  { %1143 = vmatpush3.xpose.msk.msra.mxu1 %vm83_vm0, %v64_v34 }
 0x452   :  { %1107 = vmatprep.mubr.msk.f32.mxu1 %vm391_vm2, %v477_v12  ;;  %1144 = vmatprep.subr.msk.mxu1 %vm83_vm0, %v63_v35 }
 0x454   :  { %1108 = vmatmul.mubr.msk.f32.gmra.mxu1 %vm391_vm2, %v479_v13 }
 0x455   :  { %1145 = vmatpush3.xpose.msk.msra.mxu1 %vm83_vm0, %v63_v35 }
 0x508   :  { %v1100_v17 = vpop.f32.mrf.mxu1 }
 0x50a   :  { %v594_v18 = vpop.f32.mrf.mxu1 }
 0x50c   :  { %v1103_v19 = vpop.f32.mrf.mxu1 }
 0x50e   :  { %v604_v21 = vpop.f32.mrf.mxu1 }
 0x510   :  { %v1106_v20 = vpop.f32.mrf.mxu1 }
 0x512   :  { %v614_v23 = vpop.f32.mrf.mxu1 }
 0x514   :  { %v1109_v24 = vpop.f32.mrf.mxu1 }
 0x515   :  { %1110 = vmatprep.subr.mxu0 %v1109_v24 }
 0x516   :  { %v624_v22 = vpop.f32.mrf.mxu1  ;;  %1111 = vmatpush3.msra.mxu0 %v1109_v24 }
 0x517   :  { %1112 = vmatprep.subr.mxu0 %v624_v22 }
 0x518   :  { %1113 = vmatpush3.msra.mxu0 %v624_v22 }
 0x519   :  { %1114 = vmatprep.subr.mxu0 %v1106_v20 }
 0x51a   :  { %1115 = vmatpush3.msra.mxu0 %v1106_v20 }
 0x51b   :  { %1116 = vmatprep.subr.mxu0 %v614_v23 }
 0x51c   :  { %1117 = vmatpush3.msra.mxu0 %v614_v23 }
 0x51d   :  { %1118 = vmatprep.subr.mxu0 %v1103_v19 }
 0x51e   :  { %1119 = vmatpush3.msra.mxu0 %v1103_v19 }
 0x51f   :  { %1120 = vmatprep.subr.mxu0 %v604_v21 }
 0x520   :  { %1121 = vmatpush3.msra.mxu0 %v604_v21 }
 0x521   :  { %1122 = vmatprep.subr.mxu0 %v1100_v17 }
 0x522   :  { %1123 = vmatpush3.msra.mxu0 %v1100_v17 }
 0x523   :  { %1124 = vmatprep.subr.mxu0 %v594_v18 }
 0x524   :  { %1125 = vmatpush3.msra.mxu0 %v594_v18 }
 0x525   :  { %1127 = vmatmul.mubr.msk.f32.vlgmr.msra.gmra.mxu0 %vm391_vm2, %v76_v25 }
 0x526   :  { %1129 = vmatprep.mubr.msk.f32.mxu0 %vm391_vm2, %v77_v26 }
 0x529   :  { %1130 = vmatmul.mubr.msk.f32.gmra.mxu0 %vm391_vm2, %v78_v27 }
 0x52a   :  { %1132 = vmatprep.mubr.msk.f32.mxu0 %vm391_vm2, %v79_v28 }
 0x52d   :  { %1133 = vmatmul.mubr.msk.f32.gmra.mxu0 %vm391_vm2, %v80_v29 }
 0x52e   :  { %1135 = vmatprep.mubr.msk.f32.mxu0 %vm391_vm2, %v81_v30 }
 0x531   :  { %1136 = vmatmul.mubr.msk.f32.gmra.mxu0 %vm391_vm2, %v82_v31 }
 0x5e5   :  { %v1128_v36 = vpop.f32.mrf.mxu0 }
 0x5e6   :  { %763 = vrot.lane.b32.xlu0 %v1128_v36, %s1261_s22 }
 0x5e7   :  { %v723_v37 = vpop.f32.mrf.mxu0 }
 0x5e9   :  { %v1131_v38 = vpop.f32.mrf.mxu0 }
 0x5ea   :  { %771 = vrot.lane.b32.xlu1 %v1131_v38, %s1268_s4 }
 0x5eb   :  { %v733_v39 = vpop.f32.mrf.mxu0 }
 0x5ed   :  { %v1134_v40 = vpop.f32.mrf.mxu0 }
 0x5ee   :  { %767 = vrot.lane.b32.xlu1 %v733_v39, %s1269_s11  ;;  %780 = vrot.lane.b32.xlu0 %v1134_v40, %s1261_s22 }
 0x5ef   :  { %v743_v41 = vpop.f32.mrf.mxu0 }
 0x5f1   :  { %v1137_v42 = vpop.f32.mrf.mxu0 }
 0x5f2   :  { %788 = vrot.lane.b32.xlu1 %v1137_v42, %s1268_s4 }
 0x5f3   :  { %v753_v43 = vpop.f32.mrf.mxu0 }
 0x5f4   :  { %784 = vrot.lane.b32.xlu0 %v753_v43, %s1269_s11 }
 0x658   :  { %v764_v45 = vpop.permute.xlu0 %763 }
 0x659   :  { %v774_v46 = vsel %vm245_vm1, %v723_v37, %v764_v45 }
 0x65c   :  { %v772_v44 = vpop.permute.xlu1 %771 }
 0x660   :  { %v768_v47 = vpop.permute.xlu1 %767  ;;  %v781_v49 = vpop.permute.xlu0 %780 }
 0x661   :  { %v776_v48 = vsel %vm775_vm3, %v774_v46, %v768_v47  ;;  %v791_v51 = vsel %vm245_vm1, %v743_v41, %v781_v49 }
 0x662   :  { %v778_v50 = vsel %vm777_vm4, %v776_v48, %v772_v44 }
 0x663   :  { %1146 = vmatprep.mubr.msk.f32.mxu1 %vm83_vm0, %v778_v50 }
 0x664   :  { %v789_v53 = vpop.permute.xlu1 %788 }
 0x666   :  { %v785_v52 = vpop.permute.xlu0 %784 }
 0x667   :  { %v792_v14 = vsel %vm775_vm3, %v791_v51, %v785_v52 }
 0x668   :  { %v793_v54 = vsel %vm777_vm4, %v792_v14, %v789_v53 }
 0x669   :  { %1147 = vmatmul.mubr.msk.f32.vlgmr.msra.gmra.mxu1 %vm83_vm0, %v793_v54 }
 0x729   :  { %v1148_v55 = vpop.f32.mrf.mxu1 }
 0x72a   :  { %888 = vst.msk [vmem:[#allocation7 + $0x8] sm:$0xff] %vm83_vm0, %v1148_v55 }
 0x72b   :  { %v878_v56 = vpop.f32.mrf.mxu1 }
 0x72c   :  { %887 = vst.msk [vmem:[#allocation7] sm:$0xff] %vm83_vm0, %v878_v56 }
 0x72d   :  { %1244 = shalt.err (!%p1241_p0)
}
 0x72e   :  { %900 = dma.vmem_to_hbm [thread:$0]  %s895_s13, 256, %s1584_s5, [#allocation4], %s1260_s21, %s1260_s21, %s1261_s22  }
 0x72f   :  { %1257 = dma.done.wait [#allocation4], 256  }
 0x730   :  { %1258 = vsyncadd [#allocation4], 4294967040 }
 0x731   :  { %904 = vsyncpa [#allocation3], 1 }
 0x732   :  { %905 = vsyncpa [#allocation6], 1 }
 0x733   :  { %906 = vsyncpa [#allocation4], 1 }

</bundles_post_ra>
